<compile_context>
chip_gen: v5e
topology: v5e:2x2
jax: 0.10.0
libtpu: 0.0.40
codegen_flags: <defaults>
</compile_context>

<pallas_src>
import jax
import jax.numpy as jnp
from jax.experimental import pallas as pl
from jax.experimental.pallas import tpu as pltpu


def ffn_kernel(x_ref, w1_ref, b1_ref, w2_ref, b2_ref, o_ref, acc_ref):
    k = pl.program_id(1)

    @pl.when(k == 0)
    def _init():
        # Fold b2 into the accumulator so it is added exactly once.
        acc_ref[...] = jnp.broadcast_to(
            b2_ref[...].astype(jnp.float32), acc_ref.shape)

    # First matmul: (TM, d) @ (d, TK) -> f32 (TM, TK) hidden slab on the MXU.
    h = jnp.dot(x_ref[...], w1_ref[...], preferred_element_type=jnp.float32)
    h = h + b1_ref[...].astype(jnp.float32)
    # QuickGELU in f32: h * sigmoid(1.702 * h).
    h = h * jax.nn.sigmoid(1.702 * h)
    # Second matmul: (TM, TK) @ (TK, d), accumulated into the f32 scratch.
    acc_ref[...] += jnp.dot(h.astype(w2_ref.dtype), w2_ref[...],
                            preferred_element_type=jnp.float32)

    @pl.when(k == pl.num_programs(1) - 1)
    def _finalize():
        o_ref[...] = acc_ref[...].astype(o_ref.dtype)


def _round_up(a, b):
    return ((a + b - 1) // b) * b


def feedforward(x, w1, b1, w2, b2, *, tm=256, tk=512, mxu_dtype=jnp.bfloat16):
    """x: (..., d_model). Returns same shape/dtype as x."""
    orig_shape = x.shape
    out_dtype = x.dtype
    d = orig_shape[-1]
    hidden = w1.shape[1]

    x2 = x.reshape(-1, d)
    m = x2.shape[0]

    # Token-tile size: at most the (padded) token count, multiple of 16
    # (bf16 sublane packing). Pad M up to a multiple of the tile.
    tm = min(tm, _round_up(m, 16))
    m_pad = _round_up(m, tm)
    if m_pad != m:
        x2 = jnp.pad(x2, ((0, m_pad - m), (0, 0)))

    # Hidden-tile size must evenly divide the hidden dim.
    if hidden % tk != 0:
        tk = hidden

    # bf16 operands for the MXU; biases stay f32 for the accumulator path.
    x2 = x2.astype(mxu_dtype)
    w1c = w1.astype(mxu_dtype)
    w2c = w2.astype(mxu_dtype)
    b1c = b1.reshape(1, hidden).astype(jnp.float32)
    b2c = b2.reshape(1, d).astype(jnp.float32)

    grid = (m_pad // tm, hidden // tk)

    out = pl.pallas_call(
        ffn_kernel,
        out_shape=jax.ShapeDtypeStruct((m_pad, d), out_dtype),
        grid_spec=pltpu.PrefetchScalarGridSpec(
            num_scalar_prefetch=0,
            grid=grid,
            in_specs=[
                pl.BlockSpec((tm, d), lambda i, k: (i, 0)),    # x tile
                pl.BlockSpec((d, tk), lambda i, k: (0, k)),    # w1 slice
                pl.BlockSpec((1, tk), lambda i, k: (0, k)),    # b1 slice
                pl.BlockSpec((tk, d), lambda i, k: (k, 0)),    # w2 slice
                pl.BlockSpec((1, d), lambda i, k: (0, 0)),     # b2
            ],
            # Same output block for every k -> accumulator-resident output.
            out_specs=pl.BlockSpec((tm, d), lambda i, k: (i, 0)),
            scratch_shapes=[pltpu.VMEM((tm, d), jnp.float32)],
        ),
        compiler_params=pltpu.CompilerParams(
            dimension_semantics=("parallel", "arbitrary"),
            vmem_limit_bytes=48 * 1024 * 1024,
        ),
    )(x2, w1c, b1c, w2c, b2c)

    if m_pad != m:
        out = out[:m]
    return out.reshape(orig_shape)


def init_params(key, d_model, dtype=jnp.float32):
    """Deterministic init mirroring torch.nn.Linear defaults (uniform +-1/sqrt(fan_in)).
    Weights stored transposed: w1 (d, 4d), w2 (4d, d)."""
    hidden = 4 * d_model
    k1, k2, k3, k4 = jax.random.split(key, 4)
    lim1 = 1.0 / jnp.sqrt(jnp.array(d_model, dtype))
    lim2 = 1.0 / jnp.sqrt(jnp.array(hidden, dtype))
    w1 = jax.random.uniform(k1, (d_model, hidden), dtype, -lim1, lim1)
    b1 = jax.random.uniform(k2, (hidden,), dtype, -lim1, lim1)
    w2 = jax.random.uniform(k3, (hidden, d_model), dtype, -lim2, lim2)
    b2 = jax.random.uniform(k4, (d_model,), dtype, -lim2, lim2)
    return w1, b1, w2, b2


def feedforward_ref(x, w1, b1, w2, b2, mxu_dtype=jnp.float32):
    """Pure-JAX reference; mxu_dtype mimics the kernel's bf16 MXU operands."""
    h = jnp.dot(x.astype(mxu_dtype), w1.astype(mxu_dtype),
                preferred_element_type=jnp.float32) + b1.astype(jnp.float32)
    h = h * jax.nn.sigmoid(1.702 * h)
    y = jnp.dot(h.astype(mxu_dtype), w2.astype(mxu_dtype),
                preferred_element_type=jnp.float32) + b2.astype(jnp.float32)
    return y.astype(x.dtype)


if __name__ == "__main__":
    key = jax.random.PRNGKey(0)
    d_model = 128          # lane-dense feature dim (multiple of 128)
    batch, seq = 2, 64     # M = 128 tokens

    kx, kp = jax.random.split(key)
    x = jax.random.normal(kx, (batch, seq, d_model), jnp.float32)
    w1, b1, w2, b2 = init_params(kp, d_model)

    # Small tiles so the test exercises both grid axes (grid = (2, 4)).
    y = feedforward(x, w1, b1, w2, b2, tm=64, tk=128)
    y = jax.block_until_ready(y)
    assert y.shape == x.shape and y.dtype == x.dtype

    # Tight check vs a reference using the same bf16 MXU operands.
    y_ref_bf16 = feedforward_ref(x, w1, b1, w2, b2, mxu_dtype=jnp.bfloat16)
    assert jnp.allclose(y, y_ref_bf16, atol=1e-3, rtol=1e-3), \
        "mismatch vs bf16-operand reference"

    # Loose check vs the pure-f32 reference (bf16 MXU quantization error).
    y_ref_f32 = feedforward_ref(x, w1, b1, w2, b2, mxu_dtype=jnp.float32)
    assert jnp.allclose(y, y_ref_f32, atol=5e-2, rtol=5e-2), \
        "mismatch vs f32 reference"

    print("KERNEL_OK")
</pallas_src>

<mosaic_0001>
module attributes {stable_mosaic.version = 11 : i64} {
  func.func @ffn_kernel(%arg0: i32, %arg1: i32, %arg2: memref<64x128xbf16, #tpu.memory_space<vmem>>, %arg3: memref<128x128xbf16, #tpu.memory_space<vmem>>, %arg4: memref<1x128xf32, #tpu.memory_space<vmem>>, %arg5: memref<128x128xbf16, #tpu.memory_space<vmem>>, %arg6: memref<1x128xf32, #tpu.memory_space<vmem>>, %arg7: memref<64x128xf32, #tpu.memory_space<vmem>>, %arg8: memref<64x128xf32, #tpu.memory_space<vmem>>) attributes {dimension_semantics = [#tpu.dimension_semantics<parallel>, #tpu.dimension_semantics<arbitrary>], iteration_bounds = array<i64: 2, 4>, scalar_prefetch = 0 : i64, scratch_operands = 1 : i64, tpu.core_type = #tpu.core_type<tc>, window_params = [{transform_indices = @transform_0, window_bounds = array<i64: 64, 128>}, {transform_indices = @transform_1, window_bounds = array<i64: 128, 128>}, {transform_indices = @transform_2, window_bounds = array<i64: 1, 128>}, {transform_indices = @transform_3, window_bounds = array<i64: 128, 128>}, {pipeline_mode = #tpu.pipeline_mode<synchronous>, transform_indices = @transform_4, window_bounds = array<i64: 1, 128>}, {transform_indices = @transform_5, window_bounds = array<i64: 64, 128>}]} {
    %c0_i32 = arith.constant 0 : i32
    %0 = arith.cmpi eq, %arg1, %c0_i32 : i32
    %1 = arith.extui %0 : i1 to i32
    %c0_i32_0 = arith.constant 0 : i32
    %2 = arith.cmpi ne, %1, %c0_i32_0 : i32
    scf.if %2 {
      %c0_16 = arith.constant 0 : index
      %c0_17 = arith.constant 0 : index
      %26 = vector.load %arg6[%c0_16, %c0_17] : memref<1x128xf32, #tpu.memory_space<vmem>>, vector<1x128xf32>
      %27 = vector.shape_cast %26 : vector<1x128xf32> to vector<1x128xf32>
      %28 = vector.broadcast %27 : vector<1x128xf32> to vector<64x128xf32>
      %c0_18 = arith.constant 0 : index
      %c0_19 = arith.constant 0 : index
      %29 = vector.load %arg8[%c0_18, %c0_19] : memref<64x128xf32, #tpu.memory_space<vmem>>, vector<64x128xf32>
      tpu.vector_store %arg8[%c0_18, %c0_19], %28 {strides = array<i32>} : memref<64x128xf32, #tpu.memory_space<vmem>>, vector<64x128xf32>,
    } else {
    }
    %c0 = arith.constant 0 : index
    %c0_1 = arith.constant 0 : index
    %3 = vector.load %arg2[%c0, %c0_1] : memref<64x128xbf16, #tpu.memory_space<vmem>>, vector<64x128xbf16>
    %c0_2 = arith.constant 0 : index
    %c0_3 = arith.constant 0 : index
    %4 = vector.load %arg3[%c0_2, %c0_3] : memref<128x128xbf16, #tpu.memory_space<vmem>>, vector<128x128xbf16>
    %cst = arith.constant dense<0.000000e+00> : vector<64x128xf32>
    %5 = tpu.matmul %3, %4, %cst {dimension_numbers = #tpu.dot_dimension_numbers<[1], [0], [0], [1], [0, 0, 1, 1], [], []>} : vector<64x128xbf16>, vector<128x128xbf16>, vector<64x128xf32> -> vector<64x128xf32>
    %c0_4 = arith.constant 0 : index
    %c0_5 = arith.constant 0 : index
    %6 = vector.load %arg4[%c0_4, %c0_5] : memref<1x128xf32, #tpu.memory_space<vmem>>, vector<1x128xf32>
    %7 = vector.broadcast %6 : vector<1x128xf32> to vector<64x128xf32>
    %8 = arith.addf %5, %7 : vector<64x128xf32>
    %cst_6 = arith.constant 1.702000e+00 : f32
    %9 = vector.broadcast %cst_6 : f32 to vector<64x128xf32>
    %10 = arith.mulf %9, %8 : vector<64x128xf32>
    %11 = arith.negf %10 : vector<64x128xf32>
    %12 = math.exp %11 : vector<64x128xf32>
    %cst_7 = arith.constant 1.000000e+00 : f32
    %13 = vector.broadcast %cst_7 : f32 to vector<64x128xf32>
    %14 = arith.addf %13, %12 : vector<64x128xf32>
    %15 = arith.divf %13, %14 : vector<64x128xf32>
    %16 = arith.mulf %8, %15 : vector<64x128xf32>
    %c0_8 = arith.constant 0 : index
    %c0_9 = arith.constant 0 : index
    %17 = vector.load %arg8[%c0_8, %c0_9] : memref<64x128xf32, #tpu.memory_space<vmem>>, vector<64x128xf32>
    %18 = arith.truncf %16 : vector<64x128xf32> to vector<64x128xbf16>
    %c0_10 = arith.constant 0 : index
    %c0_11 = arith.constant 0 : index
    %19 = vector.load %arg5[%c0_10, %c0_11] : memref<128x128xbf16, #tpu.memory_space<vmem>>, vector<128x128xbf16>
    %cst_12 = arith.constant dense<0.000000e+00> : vector<64x128xf32>
    %20 = tpu.matmul %18, %19, %cst_12 {dimension_numbers = #tpu.dot_dimension_numbers<[1], [0], [0], [1], [0, 0, 1, 1], [], []>} : vector<64x128xbf16>, vector<128x128xbf16>, vector<64x128xf32> -> vector<64x128xf32>
    %21 = arith.addf %17, %20 : vector<64x128xf32>
    %c0_13 = arith.constant 0 : index
    %c0_14 = arith.constant 0 : index
    %22 = vector.load %arg8[%c0_13, %c0_14] : memref<64x128xf32, #tpu.memory_space<vmem>>, vector<64x128xf32>
    tpu.vector_store %arg8[%c0_13, %c0_14], %21 {strides = array<i32>} : memref<64x128xf32, #tpu.memory_space<vmem>>, vector<64x128xf32>,
    %c3_i32 = arith.constant 3 : i32
    %23 = arith.cmpi eq, %arg1, %c3_i32 : i32
    %24 = arith.extui %23 : i1 to i32
    %c0_i32_15 = arith.constant 0 : i32
    %25 = arith.cmpi ne, %24, %c0_i32_15 : i32
    scf.if %25 {
      %c0_16 = arith.constant 0 : index
      %c0_17 = arith.constant 0 : index
      %26 = vector.load %arg8[%c0_16, %c0_17] : memref<64x128xf32, #tpu.memory_space<vmem>>, vector<64x128xf32>
      %c0_18 = arith.constant 0 : index
      %c0_19 = arith.constant 0 : index
      %27 = vector.load %arg7[%c0_18, %c0_19] : memref<64x128xf32, #tpu.memory_space<vmem>>, vector<64x128xf32>
      tpu.vector_store %arg7[%c0_18, %c0_19], %26 {strides = array<i32>} : memref<64x128xf32, #tpu.memory_space<vmem>>, vector<64x128xf32>,
    } else {
    }
    return
  }
  func.func @transform_0(%arg0: i32, %arg1: i32) -> (i32, i32) {
    %c0_i32 = arith.constant 0 : i32
    %c0_i32_0 = arith.constant 0 : i32
    return %arg0, %c0_i32 : i32, i32
  }
  func.func @transform_1(%arg0: i32, %arg1: i32) -> (i32, i32) {
    %c0_i32 = arith.constant 0 : i32
    %c0_i32_0 = arith.constant 0 : i32
    return %c0_i32, %arg1 : i32, i32
  }
  func.func @transform_2(%arg0: i32, %arg1: i32) -> (i32, i32) {
    %c0_i32 = arith.constant 0 : i32
    %c0_i32_0 = arith.constant 0 : i32
    return %c0_i32, %arg1 : i32, i32
  }
  func.func @transform_3(%arg0: i32, %arg1: i32) -> (i32, i32) {
    %c0_i32 = arith.constant 0 : i32
    %c0_i32_0 = arith.constant 0 : i32
    return %arg1, %c0_i32 : i32, i32
  }
  func.func @transform_4(%arg0: i32, %arg1: i32) -> (i32, i32) {
    %c0_i32 = arith.constant 0 : i32
    %c0_i32_0 = arith.constant 0 : i32
    %c0_i32_1 = arith.constant 0 : i32
    return %c0_i32, %c0_i32_0 : i32, i32
  }
  func.func @transform_5(%arg0: i32, %arg1: i32) -> (i32, i32) {
    %c0_i32 = arith.constant 0 : i32
    %c0_i32_0 = arith.constant 0 : i32
    return %arg0, %c0_i32 : i32, i32
  }
}

</mosaic_0001>

<bundles_post_ra>
// kernel: tpu_custom_call.1
= control target key start
LH: loop header
LB: loop body
LE: loop exit
PB: predicated region body
PF: predicated region fallthrough
CT: control target
= control target key end

     0   :  { %s2014_s0 = inlined_call_operand.hbm [shape: bf16[128,128], index: 0, kind: input, shape index: {}]   ;;  %s2015_s1 = inlined_call_operand.hbm [shape: bf16[128,512], index: 1, kind: input, shape index: {}]   ;;  %s2016_s2 = inlined_call_operand.hbm [shape: f32[1,512], index: 2, kind: input, shape index: {}]   ;;  %s2017_s3 = inlined_call_operand.hbm [shape: bf16[512,128], index: 3, kind: input, shape index: {}]   ;;  %s2018_s4 = inlined_call_operand.vmem [shape: f32[1,128], index: 4, kind: input, shape index: {}]   ;;  %s2019_s5 = inlined_call_operand.hbm [shape: f32[128,128], index: 5, kind: output, shape index: {}]  }
   0x1   :  { %2036 = sst [smem:[#allocation27_spill]] %s2014_s0 }
   0x2   :  { %2037 = sst [smem:[#allocation28_spill]] %s2015_s1 }
   0x3   :  { %2038 = sst [smem:[#allocation29_spill]] %s2016_s2 }
   0x4   :  { %2039 = sst [smem:[#allocation30_spill]] %s2019_s5 }
   0x5   :  { %10 = vsyncpa [#allocation4], 0 }
   0x6   :  { %12 = vsyncpa [#allocation4 + $0x1], 0 }
   0x7   :  { %13 = vsyncpa [#allocation7], 0 }
   0x8   :  { %15 = vsyncpa [#allocation7 + $0x1], 0 }
   0x9   :  { %16 = vsyncpa [#allocation10], 0 }
   0xa   :  { %18 = vsyncpa [#allocation10 + $0x1], 0 }
   0xb   :  { %19 = vsyncpa [#allocation5], 0 }
   0xc   :  { %21 = vsyncpa [#allocation5 + $0x1], 0  ;;  %s1585_s18 = smov 0   ;;  %s1587_s19 = smov 0  }
   0xd   :  { %s1589_s20 = smov 0   ;;  %s1591_s21 = smov 0  }
   0xe   :  { %s1593_s22 = smov 0   ;;  %s1595_s23 = smov 0  }
   0xf   :  { %s1597_s24 = smov 0   ;;  %s1599_s25 = smov 0  }
  0x10   :  { %s1601_s26 = smov 0   ;;  %s1603_s27 = smov 0  }
  0x11   :  { %s1605_s28 = smov 0  }
  0x12 LB: > { %2040 = sst [smem:[#allocation16_spill]] %s1516_s20  ;;  %p54_p0 = scmp.eq.s32.totalorder %s1548_s28, 0  ;;  %s1548_s28 = sphi %s1605_s28, %s27_s28   ;;  %s1544_s27 = sphi %s1603_s27, %s2083_s27   ;;  %s1540_s26 = sphi %s1601_s26, %s2090_s26   ;;  %s1536_s25 = sphi %s1599_s25, %s2089_s25   ;;  %s1532_s24 = sphi %s1597_s24, %s2088_s24   ;;  %s1528_s23 = sphi %s1595_s23, %s2080_s23   ;;  %s1524_s22 = sphi %s1593_s22, %s2087_s22   ;;  %s1520_s21 = sphi %s1591_s21, %s2086_s21   ;;  %s1516_s20 = sphi %s1589_s20, %s2078_s20   ;;  %s1512_s19 = sphi %s1587_s19, %s2085_s19   ;;  %s1508_s18 = sphi %s1585_s18, %s2084_s18  }
  0x13   : > { %2041 = sst [smem:[#allocation17_spill]] %s1520_s21  ;;  %p79_p1 = scmp.ne.s32.totalorder %s1516_s20, %s1512_s19 }
  0x14   : > { %2042 = sst [smem:[#allocation18_spill]] %s1528_s23  ;;  %p85_p2 = scmp.ne.s32.totalorder %s1512_s19, %s1508_s18 }
  0x15   : > { %2043 = sst [smem:[#allocation19_spill]] %s1536_s25  ;;  %p2026_p3 = scmp.lt.s32.totalorder %s1548_s28, 8 }
  0x16   : > { %2044 = sst [smem:[#allocation20_spill]] %s1544_s27  ;;  %p81_p4 = por %p79_p1, %p54_p0 }
  0x17   : > { %2045 = sst [smem:[#allocation21_spill]] %s1548_s28  ;;  %s233_s30 = sand.u32 1, %s1548_s28  }
  0x18   : > { %s1651_s6 = sand.u32 1, %s1516_s20   ;;  %s999_s8 = sshll.u32 %s1540_s26, 2 }
  0x19   : > { %s2020_s7 = sshll.u32 %s1651_s6, 6  ;;  %s2046_s1 = sld [smem:[#allocation28_spill]] }
  0x1a   : > { %s237_s13 = scalar_lea.vmem [#allocation6], %s2020_s7  ;;  %p1662_p5 = pnand %p2026_p3, %p81_p4 }
  0x1b   : > { %s244_s14 = sshll.u32 %s237_s13, 4  ;;  %p1003_p6 = scmp.ge.s32.totalorder %s1548_s28, 1  ;;  %s245_s14 = int_to_ptr.vmem [resolvable:$true] %s244_s14 }
  0x1c   : > { %p291_p7 = scmp.lt.s32.totalorder %s1548_s28, 9  ;;  %s1668_s16 = scalar_lea.sflag [#allocation7], %s233_s30 }
  0x1d   : > { %s1550_s17 = smov 256   ;;  %s2023_s9 = smov 4  }
  0x1e   : > { %p1675_p8 = pnand %p1003_p6, %p291_p7  ;;  %s1680_s30 = sadd.s32 4294967295, %s1548_s28  }
  0x1f   : > { %s241_s11 = scalar_lea.hbm %s2046_s1, %s999_s8  ;;  %s2021_s8 = smov 64  }
  0x20   : > { %s242_s12 = sshll.u32 %s241_s11, 4  ;;  %s992_s11 = sadd.s32 4294967294, %s1548_s28   ;;  %s243_s12 = int_to_ptr.hbm [resolvable:$true] %s242_s12 }
  0x21   : > { %1158 = dma.hbm_to_vmem [thread:$0]  (!%p1662_p5), %s243_s12, 1024, %s245_s14, %s1668_s16, %s1550_s17, %s2021_s8, %s2023_s9  }
  0x22   : > { %s36_s13 = sadd.s32 1, %s1540_s26  ;;  %s39_s7 = sadd.s32 1, %s1544_s27 }
  0x23   : > { %p37_p9 = scmp.ge.s32.totalorder %s36_s13, 4  ;;  %s46_s29 = sadd.s32 1, %s1528_s23 }
  0x24   : > { %p53_p10 = scmp.ne.s32.totalorder %s1528_s23, %s1524_s22  ;;  %p59_p11 = scmp.ne.s32.totalorder %s1524_s22, %s1520_s21 }
  0x25   : > { %s2092_s13 = smov (%p37_p9, %s36_s13), 0  ;;  %s2094_s7 = smov (!%p37_p9, %s39_s7), %s1544_s27 }
  0x26   : > { %2049 = sst [smem:[#allocation22_spill]] %s2092_s13  ;;  %p1698_p12 = por %p54_p0, %p53_p10 }
  0x27   : > { %p60_p13 = scmp.eq.s32.totalorder %s1680_s30, 0  ;;  %p41_p1 = scmp.ge.s32.totalorder %s2094_s7, 2 }
  0x28   : > { %s69_s14 = ssub.s32 %s1540_s26, %s2092_s13  ;;  %s2053_s8 = sadd.s32 1, %s1516_s20 }
  0x29   : > { %p1708_p4 = por %p60_p13, %p59_p11  ;;  %p70_p6 = scmp.eq.s32.totalorder %s69_s14, 0 }
  0x2a   : > { %s2096_s7 = smov (%p41_p1, %s2094_s7), 0  ;;  %p1724_p0 = por %p85_p2, %p60_p13 }
  0x2b   : > { %2052 = sst [smem:[#allocation23_spill]] %s2096_s7  ;;  %s43_s1 = ssub.s32 %s1544_s27, %s2096_s7 }
  0x2c   : > { %s1717_s9 = scalar_select %p70_p6, %s1516_s20, %s2053_s8  }
  0x2d   : > { %p44_p7 = scmp.eq.s32.totalorder %s43_s1, 0  ;;  %p182_p9 = scmp.eq.s32.totalorder %s1680_s30, 7 }
  0x2e   : > { %2054 = sst [smem:[#allocation24_spill]] %s1717_s9  ;;  %p188_p3 = scmp.eq.s32.totalorder %s992_s11, 7 }
  0x2f   : > { %s211_s13 = sand.u32 1, %s1528_s23   ;;  %p1736_p1 = por %p182_p9, %p53_p10 }
  0x30   : > { %s1731_s14 = scalar_select %p44_p7, %s1528_s23, %s46_s29  }
  0x31   : > { %p1743_p2 = por %p188_p3, %p59_p11  ;;  %s995_s8 = sshll.u32 %s211_s13, 5 }
  0x32   : > { %2056 = sst [smem:[#allocation25_spill]] %s1731_s14  ;;  %s1103_s7 = sshll.u32 %s1544_s27, 5 }
  0x33   : > { %s2058_s18 = scalar_select %p1743_p2, 1, 0 }
  0x34   : > { %s2060_s0 = sld [smem:[#allocation27_spill]]  ;;  %s215_s11 = scalar_lea.vmem [#allocation3], %s995_s8 }
  0x35   : > { %2059 = sst [smem:[#allocation26_spill]] %s2058_s18  ;;  %s223_s14 = sshll.u32 %s215_s11, 4  ;;  %s224_s14 = int_to_ptr.vmem [resolvable:$true] %s223_s14 }
  0x36   : > { %p2061_p3 = scmp.lt.s32.totalorder %s1548_s28, 8  ;;  %s2062_s2 = sld [smem:[#allocation29_spill]] }
  0x37   : > { %s212_s9 = scalar_lea.sflag [#allocation4], %s211_s13  ;;  %s2063_s1 = smov 4  }
  0x38   : > { %p1153_p10 = pnand %p2061_p3, %p1698_p12  ;;  %s257_s8 = scalar_lea.vmem [#allocation8], %s1651_s6 }
  0x39   : > { %s1104_s12 = sshll.u32 %s1540_s26, 6  ;;  %s2065_s18 = sshll.u32 %s1651_s6, 6 }
  0x3a   : > { %s220_s29 = scalar_lea.hbm %s2060_s0, %s1103_s7  ;;  %s2064_s7 = smov 64  }
  0x3b   : > { %s221_s23 = sshll.u32 %s220_s29, 4  ;;  %s264_s29 = sshll.u32 %s257_s8, 4  ;;  %s222_s23 = int_to_ptr.hbm [resolvable:$true] %s221_s23  ;;  %s265_s29 = int_to_ptr.vmem [resolvable:$true] %s264_s29 }
  0x3c   : > { %s260_s27 = scalar_lea.hbm %s2062_s2, %s1540_s26  ;;  %s280_s20 = scalar_lea.hbm %s2017_s3, %s1104_s12 }
  0x3d   : > { %s262_s21 = sshll.u32 %s260_s27, 4  ;;  %s275_s2 = scalar_lea.vmem [#allocation9], %s2065_s18  ;;  %s263_s21 = int_to_ptr.hbm [resolvable:$true] %s262_s21 }
  0x3e   : > { %1155 = dma.hbm_to_vmem [thread:$0]  (!%p1153_p10), %s222_s23, 512, %s224_s14, %s212_s9, %s2064_s7, %s2064_s7, %s2063_s1  }
  0x3f   : > { %1161 = dma.hbm_to_vmem [thread:$0]  (!%p1662_p5), %s263_s21, 16, %s265_s29, %s1668_s16  }
  0x40   : > { %s283_s27 = sshll.u32 %s275_s2, 4  ;;  %s281_s28 = sshll.u32 %s280_s20, 4  ;;  %s284_s27 = int_to_ptr.vmem [resolvable:$true] %s283_s27  ;;  %s282_s28 = int_to_ptr.hbm [resolvable:$true] %s281_s28 }
  0x41   : > { %s272_s13 = scalar_lea.sflag [#allocation10], %s1651_s6  ;;  %295 = sbr.rel (%p1675_p8) target bundleno = 496 (0x1f0), region = 40 }
  0x42   : > { %1164 = dma.hbm_to_vmem [thread:$0]  (!%p1662_p5), %s282_s28, 1024, %s284_s27, %s272_s13, %s2064_s7, %s2064_s7, %s2063_s1  }
  0x43   : > { %s1781_s21 = sand.u32 (!%p1675_p8), 1, %s1524_s22  }
  0x44   : > { %s1004_s0 = sshll.u32 (!%p1675_p8), %s1781_s21, 5  ;;  %s298_s2 = scalar_lea.sflag (!%p1675_p8), [#allocation4], %s1781_s21 }
  0x45   : > { %s1785_s23 = scalar_lea.vmem (!%p1675_p8), [#allocation3], %s1004_s0 }
  0x46   : > { %1491 = dma.done.wait (%p1708_p4), %s298_s2, 512  }
  0x47   : > { %1493 = vsyncadd (%p1708_p4), %s298_s2, 4294966784  ;;  %s307_s28 = sand.u32 1, %s1680_s30   ;;  %s1793_s6 = sand.u32 1, %s1512_s19  }
  0x48   : > { %s1005_s15 = sshll.u32 %s1793_s6, 6  ;;  %s308_s16 = scalar_lea.sflag [#allocation7], %s307_s28 }
  0x49   : > { %s1796_s10 = scalar_lea.vmem [#allocation6], %s1005_s15 }
  0x4a   : > { %1495 = dma.done.wait (%p1724_p0), %s308_s16, 1040  }
  0x4b   : > { %1497 = vsyncadd (%p1724_p0), %s308_s16, 4294966256  ;;  %s320_s17 = scalar_lea.vmem [#allocation8], %s1793_s6  ;;  %s327_s14 = scalar_lea.sflag [#allocation10], %s1793_s6 }
  0x4c   : > { %s1804_s9 = scalar_lea.vmem [#allocation9], %s1005_s15 }
  0x4d   : > { %1499 = dma.done.wait (%p1724_p0), %s327_s14, 1024  }
  0x4e   : > { %1501 = vsyncadd (%p1724_p0), %s327_s14, 4294966272  ;;  %s1007_s30 = sshll.u32 %s1781_s21, 6  ;;  %p1008_p5 = scmp.ne.s32.totalorder %s1532_s24, 0 }
  0x4f   : > { %s1811_s1 = scalar_lea.vmem [#allocation11], %s1007_s30 }
  0x50   : > { %378 = sbr.rel (%p1008_p5) target bundleno = 94 (0x5e), region = 60 }
  0x55   : > { %v1264_v0 = vld [vmem:[%s2018_s4] ss:$0 sm:$0xff] }
  0x56   : > { %383 = vst [vmem:[#allocation2 + $0x30] sm:$0xff] %v1264_v0 }
  0x57   : > { %384 = vst [vmem:[#allocation2] sm:$0xff] %v1264_v0 }
  0x58   : > { %385 = vst [vmem:[#allocation2 + $0x18] sm:$0xff] %v1264_v0 }
  0x59   : > { %386 = vst [vmem:[#allocation2 + $0x10] sm:$0xff] %v1264_v0 }
  0x5a   : > { %387 = vst [vmem:[#allocation2 + $0x8] sm:$0xff] %v1264_v0 }
  0x5b   : > { %388 = vst [vmem:[#allocation2 + $0x20] sm:$0xff] %v1264_v0 }
  0x5c   : > { %389 = vst [vmem:[#allocation2 + $0x28] sm:$0xff] %v1264_v0 }
  0x5d   : > { %390 = vst [vmem:[#allocation2 + $0x38] sm:$0xff] %v1264_v0 }
  0x5e PF: > { %v1116_v1 = vld [vmem:[%s1796_s10 + $0x38] sm:$0xff]  ;;  %v1115_v2 = vld [vmem:[%s1796_s10 + $0x30] sm:$0xff]  ;;  %v1114_v3 = vld [vmem:[%s1796_s10 + $0x28] sm:$0xff]  ;;  %p1097_p8 = scmp.ne.s32.totalorder %s1532_s24, 3 }
  0x5f   : > { %491 = vmatpush.bf16.msra.mxu0 %v1116_v1  ;;  %1126 = vmatpush.bf16.msra.mxu2 %v1116_v1  ;;  %v1113_v4 = vld [vmem:[%s1796_s10 + $0x20] sm:$0xff]  ;;  %v1112_v5 = vld [vmem:[%s1796_s10 + $0x18] sm:$0xff]  ;;  %v1111_v6 = vld [vmem:[%s1796_s10 + $0x10] sm:$0xff] }
  0x60   : > { %v1110_v7 = vld [vmem:[%s1796_s10 + $0x8] sm:$0xff]  ;;  %v1109_v8 = vld [vmem:[%s1796_s10] sm:$0xff]  ;;  %v1107_v10 = vld [vmem:[%s1785_s23 + $0x10] sm:$0xff] }
  0x61   : > { %v1105_v9 = vld [vmem:[%s1785_s23] sm:$0xff]  ;;  %v1106_v11 = vld [vmem:[%s1785_s23 + $0x8] sm:$0xff]  ;;  %v1108_v12 = vld [vmem:[%s1785_s23 + $0x18] sm:$0xff] }
  0x62   : > { %v1124_v13 = vld [vmem:[%s1804_s9 + $0x38] sm:$0xff]  ;;  %v1123_v14 = vld [vmem:[%s1804_s9 + $0x30] sm:$0xff]  ;;  %v1122_v15 = vld [vmem:[%s1804_s9 + $0x28] sm:$0xff] }
  0x63   : > { %492 = vmatpush.bf16.msra.mxu0 %v1115_v2  ;;  %1127 = vmatpush.bf16.msra.mxu2 %v1115_v2  ;;  %v1834_v16 = vld [vmem:[%s320_s17] ss:$0 sm:$0xff]  ;;  %v1121_v17 = vld [vmem:[%s1804_s9 + $0x20] sm:$0xff]  ;;  %v1119_v26 = vld [vmem:[%s1804_s9 + $0x10] sm:$0xff] }
  0x64   : > { %764 = vmatpush.bf16.msra.mxu1 %v1124_v13  ;;  %1134 = vmatpush.bf16.msra.mxu3 %v1124_v13  ;;  %v1120_v21 = vld [vmem:[%s1804_s9 + $0x18] sm:$0xff]  ;;  %v1118_v31 = vld [vmem:[%s1804_s9 + $0x8] sm:$0xff]  ;;  %v1117_v38 = vld [vmem:[%s1804_s9] sm:$0xff] }
  0x67   : > { %493 = vmatpush.bf16.msra.mxu0 %v1114_v3  ;;  %1128 = vmatpush.bf16.msra.mxu2 %v1114_v3 }
  0x68   : > { %765 = vmatpush.bf16.msra.mxu1 %v1123_v14  ;;  %1135 = vmatpush.bf16.msra.mxu3 %v1123_v14 }
  0x6b   : > { %494 = vmatpush.bf16.msra.mxu0 %v1113_v4  ;;  %1129 = vmatpush.bf16.msra.mxu2 %v1113_v4 }
  0x6c   : > { %766 = vmatpush.bf16.msra.mxu1 %v1122_v15  ;;  %1136 = vmatpush.bf16.msra.mxu3 %v1122_v15 }
  0x6f   : > { %495 = vmatpush.bf16.msra.mxu0 %v1112_v5  ;;  %1130 = vmatpush.bf16.msra.mxu2 %v1112_v5 }
  0x70   : > { %767 = vmatpush.bf16.msra.mxu1 %v1121_v17  ;;  %1137 = vmatpush.bf16.msra.mxu3 %v1121_v17 }
  0x73   : > { %496 = vmatpush.bf16.msra.mxu0 %v1111_v6  ;;  %1131 = vmatpush.bf16.msra.mxu2 %v1111_v6 }
  0x74   : > { %768 = vmatpush.bf16.msra.mxu1 %v1120_v21  ;;  %1138 = vmatpush.bf16.msra.mxu3 %v1120_v21 }
  0x77   : > { %497 = vmatpush.bf16.msra.mxu0 %v1110_v7  ;;  %1132 = vmatpush.bf16.msra.mxu2 %v1110_v7 }
  0x78   : > { %769 = vmatpush.bf16.msra.mxu1 %v1119_v26  ;;  %1139 = vmatpush.bf16.msra.mxu3 %v1119_v26 }
  0x7b   : > { %498 = vmatpush.bf16.msra.mxu0 %v1109_v8  ;;  %1133 = vmatpush.bf16.msra.mxu2 %v1109_v8 }
  0x7c   : > { %770 = vmatpush.bf16.msra.mxu1 %v1118_v31  ;;  %1140 = vmatpush.bf16.msra.mxu3 %v1118_v31 }
  0x7e   : > { %499 = vmatmul.bf16.vlgmr.msra.gmra.mxu0 %v1105_v9  ;;  %509 = vmatmul.bf16.vlgmr.msra.gmra.mxu2 %v1107_v10 }
  0x80   : > { %771 = vmatpush.bf16.msra.mxu1 %v1117_v38  ;;  %1141 = vmatpush.bf16.msra.mxu3 %v1117_v38 }
  0x8e   : > { %504 = vmatmul.bf16.gmra.mxu0 %v1106_v11  ;;  %514 = vmatmul.bf16.gmra.mxu2 %v1108_v12 }
  0xfb   : > { %v500_v18 = vpop.f32.mrf.mxu0 }
  0xfc   : > { %v1838_v19 = vadd.f32 %v1834_v16, %v500_v18 }
  0xfe   : > { %v1057_v20 = vmul.f32 -1.702, %v1838_v19 }
 0x100   : > { %v536_v22 = vmul.f32 1.442695, %v1057_v20 }
 0x101   : > { %v510_v23 = vpop.f32.mrf.mxu2 }
 0x102   : > { %1266 = vpow2.f32 %v536_v22  ;;  %v1843_v24 = vadd.f32 %v1834_v16, %v510_v23 }
 0x103   : > { %v502_v25 = vpop.f32.mrf.mxu0 }
 0x104   : > { %v1061_v27 = vmul.f32 -1.702, %v1843_v24  ;;  %v1848_v28 = vadd.f32 %v1834_v16, %v502_v25 }
 0x106   : > { %v544_v29 = vmul.f32 1.442695, %v1061_v27  ;;  %v1058_v30 = vmul.f32 -1.702, %v1848_v28 }
 0x108   : > { %v1267_v32 = vpop.eup %1266  ;;  %1268 = vpow2.f32 %v544_v29  ;;  %v538_v33 = vmul.f32 1.442695, %v1058_v30 }
 0x109   : > { %v552_v34 = vadd.f32 1.0, %v1267_v32  ;;  %v512_v35 = vpop.f32.mrf.mxu2 }
 0x10a   : > { %1270 = vpow2.f32 %v538_v33  ;;  %v1853_v36 = vadd.f32 %v1834_v16, %v512_v35 }
 0x10b   : > { %1272 = vrcp.f32 %v552_v34  ;;  %v505_v37 = vpop.f32.mrf.mxu0  ;;  %v569_v58 = vand.u32 2147483647, %v552_v34  ;;  %v571_v63 = vand.u32 2147483648, %v552_v34  ;;  %vm565_vm0 = vweird.f32 %v552_v34 }
 0x10c   : > { %v1062_v39 = vmul.f32 -1.702, %v1853_v36  ;;  %v1858_v40 = vadd.f32 %v1834_v16, %v505_v37 }
 0x10d   : > { %vm1886_vm2 = vcmp.eq.f32.partialorder %v569_v58, 8.507059e+37  ;;  %v572_v9 = vor.u32 1.1754944e-38, %v571_v63 }
 0x10e   : > { %v1269_v41 = vpop.eup %1268  ;;  %v546_v42 = vmul.f32 1.442695, %v1062_v39  ;;  %v1059_v43 = vmul.f32 -1.702, %v1858_v40 }
 0x10f   : > { %v1861_v44 = vadd.f32 1.0, %v1269_v41 }
 0x110   : > { %v1271_v45 = vpop.eup %1270  ;;  %1274 = vpow2.f32 %v546_v42  ;;  %v540_v46 = vmul.f32 1.442695, %v1059_v43 }
 0x111   : > { %v1863_v47 = vpop.eup %1272  ;;  %1276 = vrcp.f32 %v1861_v44  ;;  %v515_v48 = vpop.f32.mrf.mxu2  ;;  %v553_v50 = vadd.f32 1.0, %v1271_v45  ;;  %vm625_vm4 = vweird.f32 %v1861_v44  ;;  %v629_v12 = vand.u32 2147483647, %v1861_v44 }
 0x112   : > { %v561_v49 = vmul.f32 %v1863_v47, %v552_v34  ;;  %1278 = vpow2.f32 %v540_v46  ;;  %v1868_v51 = vadd.f32 %v1834_v16, %v515_v48  ;;  %vm566_vm1 = vweird.f32 %v1863_v47 }
 0x113   : > { %v507_v52 = vpop.f32.mrf.mxu0  ;;  %1280 = vrcp.f32 %v553_v50  ;;  %vm1894_vm3 = vmor %vm565_vm0, %vm566_vm1  ;;  %v584_v14 = vand.u32 2147483647, %v553_v50  ;;  %v586_v15 = vand.u32 2147483648, %v553_v50  ;;  %v631_v22 = vand.u32 2147483648, %v1861_v44 }
 0x114   : > { %v562_v53 = vsub.f32 1.0, %v561_v49  ;;  %v1063_v54 = vmul.f32 -1.702, %v1868_v51  ;;  %v1872_v56 = vadd.f32 %v1834_v16, %v507_v52  ;;  %vm580_vm7 = vweird.f32 %v553_v50 }
 0x115   : > { %vm585_vm9 = vcmp.eq.f32.partialorder %v584_v14, 8.507059e+37  ;;  %v587_v33 = vor.u32 1.1754944e-38, %v586_v15  ;;  %v632_v45 = vor.u32 1.1754944e-38, %v631_v22  ;;  %vm630_vm12 = vcmp.eq.f32.partialorder %v629_v12, 8.507059e+37 }
 0x116   : > { %v1275_v55 = vpop.eup %1274  ;;  %v548_v60 = vmul.f32 1.442695, %v1063_v54  ;;  %v563_v62 = vmul.f32 %v1863_v47, %v562_v53  ;;  %v1060_v4 = vmul.f32 -1.702, %v1872_v56 }
 0x117   : > { %v1874_v57 = vpop.eup %1276  ;;  %v1876_v59 = vadd.f32 1.0, %v1275_v55 }
 0x118   : > { %v1279_v61 = vpop.eup %1278  ;;  %v621_v0 = vmul.f32 %v1874_v57, %v1861_v44  ;;  %v564_v8 = vadd.f32 %v1863_v47, %v563_v62  ;;  %vm626_vm5 = vweird.f32 %v1874_v57  ;;  %v542_v17 = vmul.f32 1.442695, %v1060_v4 }
 0x119   : > { %1282 = vrcp.f32 %v1876_v59  ;;  %v1281_v1 = vpop.eup %1280  ;;  %v1883_v3 = vadd.f32 1.0, %v1279_v61  ;;  %v517_v7 = vpop.f32.mrf.mxu2  ;;  %vm1912_vm8 = vmor %vm625_vm4, %vm626_vm5  ;;  %v644_v35 = vand.u32 2147483647, %v1876_v59  ;;  %v646_v37 = vand.u32 2147483648, %v1876_v59 }
 0x11a   : > { %v622_v2 = vsub.f32 1.0, %v621_v0  ;;  %1284 = vpow2.f32 %v548_v60  ;;  %v576_v6 = vmul.f32 %v1281_v1, %v553_v50  ;;  %v1902_v18 = vadd.f32 %v1834_v16, %v517_v7 }
 0x11b   : > { %1286 = vrcp.f32 %v1883_v3  ;;  %vm581_vm6 = vweird.f32 %v1281_v1  ;;  %v568_v26 = vsel %vm1894_vm3, %v1863_v47, %v564_v8  ;;  %vm640_vm13 = vweird.f32 %v1876_v59 }
 0x11c   : > { %v623_v10 = vmul.f32 %v1874_v57, %v622_v2  ;;  %v577_v13 = vsub.f32 1.0, %v576_v6  ;;  %1288 = vpow2.f32 %v542_v17  ;;  %v1064_v31 = vmul.f32 -1.702, %v1902_v18  ;;  %vm582_vm10 = vmor %vm580_vm7, %vm581_vm6 }
 0x11d   : > { %v573_v38 = vsel %vm1886_vm2, %v572_v9, %v568_v26  ;;  %v647_v53 = vor.u32 1.1754944e-38, %v646_v37  ;;  %vm645_vm15 = vcmp.eq.f32.partialorder %v644_v35, 8.507059e+37  ;;  %vm595_vm0 = vweird.f32 %v1883_v3 }
 0x11e   : > { %v624_v21 = vadd.f32 %v1874_v57, %v623_v10  ;;  %v578_v23 = vmul.f32 %v1281_v1, %v577_v13  ;;  %v550_v47 = vmul.f32 1.442695, %v1064_v31  ;;  %v680_v49 = vmul.f32 %v573_v38, %v1838_v19 }
 0x11f   : > { %v1283_v20 = vpop.eup %1282  ;;  %v599_v4 = vand.u32 2147483647, %v1883_v3 }
 0x120   : > { %v1285_v25 = vpop.eup %1284  ;;  %v636_v27 = vmul.f32 %v1283_v20, %v1876_v59  ;;  %v579_v29 = vadd.f32 %v1281_v1, %v578_v23  ;;  %v628_v39 = vsel %vm1912_vm8, %v1874_v57, %v624_v21  ;;  %vm641_vm11 = vweird.f32 %v1283_v20 }
 0x121   : > { %v1916_v30 = vadd.f32 1.0, %v1285_v25  ;;  %v1919_v32 = vpop.eup %1286  ;;  %v633_v52 = vsel %vm630_vm12, %v632_v45, %v628_v39  ;;  %vm642_vm14 = vmor %vm640_vm13, %vm641_vm11  ;;  %vm600_vm3 = vcmp.eq.f32.partialorder %v599_v4, 8.507059e+37 }
 0x122   : > { %v637_v34 = vsub.f32 1.0, %v636_v27  ;;  %v583_v41 = vsel %vm582_vm10, %v1281_v1, %v579_v29  ;;  %v591_v44 = vmul.f32 %v1919_v32, %v1883_v3  ;;  %v1289_v48 = vpop.eup %1288  ;;  %vm596_vm1 = vweird.f32 %v1919_v32 }
 0x123   : > { %1290 = vrcp.f32 %v1916_v30  ;;  %v588_v42 = vsel %vm585_vm9, %v587_v33, %v583_v41  ;;  %v555_v54 = vadd.f32 1.0, %v1289_v48  ;;  %vm597_vm2 = vmor %vm595_vm0, %vm596_vm1  ;;  %v661_v22 = vand.u32 2147483648, %v1916_v30 }
 0x124   : > { %v638_v43 = vmul.f32 %v1283_v20, %v637_v34  ;;  %v681_v46 = vmul.f32 %v588_v42, %v1848_v28  ;;  %1292 = vpow2.f32 %v550_v47  ;;  %v592_v57 = vsub.f32 1.0, %v591_v44  ;;  %v688_v44 = vld [vmem:[#allocation2 + $0x30] sm:$0xff]  ;;  %v689_v47 = vld [vmem:[#allocation2] sm:$0xff] }
 0x125   : > { %1294 = vrcp.f32 %v555_v54  ;;  %v684_v28 = vmul.f32 %v633_v52, %v1843_v24  ;;  %v601_v24 = vand.u32 2147483648, %v1883_v3  ;;  %v616_v10 = vand.u32 2147483648, %v555_v54 }
 0x126   : > { %v639_v50 = vadd.f32 %v1283_v20, %v638_v43  ;;  %v696_v58 = vpack.c.bf16 %v681_v46, %v680_v49  ;;  %v593_v59 = vmul.f32 %v1919_v32, %v592_v57  ;;  %v614_v13 = vand.u32 2147483647, %v555_v54  ;;  %v692_v49 = vld [vmem:[#allocation2 + $0x8] sm:$0xff] }
 0x127   : > { %v602_v8 = vor.u32 1.1754944e-38, %v601_v24  ;;  %vm610_vm6 = vweird.f32 %v555_v54  ;;  %vm655_vm9 = vweird.f32 %v1916_v30  ;;  %v659_v25 = vand.u32 2147483647, %v1916_v30 }
 0x128   : > { %v643_v55 = vsel %vm642_vm14, %v1283_v20, %v639_v50  ;;  %772 = vmatmul.bf16.vlgmr.msra.gmra.mxu1 %v696_v58  ;;  %v617_v20 = vor.u32 1.1754944e-38, %v616_v10  ;;  %vm615_vm8 = vcmp.eq.f32.partialorder %v614_v13, 8.507059e+37  ;;  %v662_v35 = vor.u32 1.1754944e-38, %v661_v22 }
 0x129   : > { %v1291_v60 = vpop.eup %1290  ;;  %v648_v61 = vsel %vm645_vm15, %v647_v53, %v643_v55  ;;  %vm660_vm12 = vcmp.eq.f32.partialorder %v659_v25, 8.507059e+37  ;;  %v690_v55 = vld [vmem:[#allocation2 + $0x18] sm:$0xff] }
 0x12a   : > { %v685_v19 = vmul.f32 %v648_v61, %v1853_v36  ;;  %v651_v62 = vmul.f32 %v1291_v60, %v1916_v30  ;;  %v1293_v0 = vpop.eup %1292  ;;  %v594_v36 = vadd.f32 %v1919_v32, %v593_v59  ;;  %vm656_vm5 = vweird.f32 %v1291_v60 }
 0x12b   : > { %v559_v1 = vadd.f32 1.0, %v1293_v0  ;;  %v1295_v2 = vpop.eup %1294  ;;  %vm657_vm10 = vmor %vm655_vm9, %vm656_vm5 }
 0x12c   : > { %v698_v63 = vpack.c.bf16 %v685_v19, %v684_v28  ;;  %v652_v5 = vsub.f32 1.0, %v651_v62  ;;  %v606_v6 = vmul.f32 %v1295_v2, %v555_v54  ;;  %v598_v11 = vsel %vm597_vm2, %v1919_v32, %v594_v36  ;;  %v693_v54 = vld [vmem:[#allocation2 + $0x20] sm:$0xff]  ;;  %v694_v19 = vld [vmem:[#allocation2 + $0x28] sm:$0xff] }
 0x12d   : > { %1296 = vrcp.f32 %v559_v1  ;;  %vm611_vm4 = vweird.f32 %v1295_v2  ;;  %v603_v3 = vsel %vm600_vm3, %v602_v8, %v598_v11  ;;  %v676_v31 = vand.u32 2147483648, %v559_v1 }
 0x12e   : > { %782 = vmatmul.bf16.vlgmr.msra.gmra.mxu3 %v698_v63  ;;  %v607_v7 = vsub.f32 1.0, %v606_v6  ;;  %v653_v9 = vmul.f32 %v1291_v60, %v652_v5  ;;  %vm612_vm7 = vmor %vm610_vm6, %vm611_vm4  ;;  %v682_v16 = vmul.f32 %v603_v3, %v1858_v40  ;;  %v674_v34 = vand.u32 2147483647, %v559_v1  ;;  %v695_v63 = vld [vmem:[#allocation2 + $0x38] sm:$0xff] }
 0x12f   : > { %vm670_vm13 = vweird.f32 %v559_v1  ;;  %v677_v30 = vor.u32 1.1754944e-38, %v676_v31 }
 0x130   : > { %v608_v12 = vmul.f32 %v1295_v2, %v607_v7  ;;  %v654_v17 = vadd.f32 %v1291_v60, %v653_v9  ;;  %vm675_vm15 = vcmp.eq.f32.partialorder %v674_v34, 8.507059e+37 }
 0x132   : > { %v609_v15 = vadd.f32 %v1295_v2, %v608_v12  ;;  %v658_v32 = vsel %vm657_vm10, %v1291_v60, %v654_v17  ;;  %v691_v60 = vld [vmem:[#allocation2 + $0x10] sm:$0xff] }
 0x133   : > { %v1297_v14 = vpop.eup %1296  ;;  %v663_v39 = vsel %vm660_vm12, %v662_v35, %v658_v32 }
 0x134   : > { %v666_v21 = vmul.f32 %v1297_v14, %v559_v1  ;;  %v613_v23 = vsel %vm612_vm7, %v1295_v2, %v609_v15  ;;  %vm671_vm11 = vweird.f32 %v1297_v14  ;;  %v686_v42 = vmul.f32 %v663_v39, %v1868_v51 }
 0x135   : > { %v618_v26 = vsel %vm615_vm8, %v617_v20, %v613_v23  ;;  %vm672_vm14 = vmor %vm670_vm13, %vm671_vm11 }
 0x136   : > { %v667_v27 = vsub.f32 1.0, %v666_v21  ;;  %v683_v29 = vmul.f32 %v618_v26, %v1872_v56 }
 0x138   : > { %v668_v33 = vmul.f32 %v1297_v14, %v667_v27  ;;  %v697_v37 = vpack.c.bf16 %v683_v29, %v682_v16 }
 0x13a   : > { %v669_v38 = vadd.f32 %v1297_v14, %v668_v33  ;;  %777 = vmatmul.bf16.gmra.mxu1 %v697_v37 }
 0x13c   : > { %v673_v41 = vsel %vm672_vm14, %v1297_v14, %v669_v38 }
 0x13d   : > { %v678_v40 = vsel %vm675_vm15, %v677_v30, %v673_v41 }
 0x13e   : > { %v687_v56 = vmul.f32 %v678_v40, %v1902_v18 }
 0x140   : > { %v699_v43 = vpack.c.bf16 %v687_v56, %v686_v42 }
 0x142   : > { %787 = vmatmul.bf16.gmra.mxu3 %v699_v43 }
 0x1a5   : > { %v773_v45 = vpop.f32.mrf.mxu1 }
 0x1a6   : > { %v793_v46 = vadd.f32 %v773_v45, %v688_v44 }
 0x1a8   : > { %801 = vst [vmem:[#allocation2 + $0x30] sm:$0xff] %v793_v46 }
 0x1ad   : > { %v775_v48 = vpop.f32.mrf.mxu1 }
 0x1ae   : > { %v794_v50 = vadd.f32 %v775_v48, %v689_v47 }
 0x1b0   : > { %802 = vst [vmem:[#allocation2] sm:$0xff] %v794_v50 }
 0x1b1   : > { %v783_v52 = vpop.f32.mrf.mxu3 }
 0x1b2   : > { %v797_v53 = vadd.f32 %v783_v52, %v692_v49 }
 0x1b4   : > { %805 = vst [vmem:[#allocation2 + $0x8] sm:$0xff] %v797_v53 }
 0x1b7   : > { %v778_v58 = vpop.f32.mrf.mxu1 }
 0x1b8   : > { %v795_v18 = vadd.f32 %v778_v58, %v690_v55 }
 0x1b9   : > { %v785_v57 = vpop.f32.mrf.mxu3 }
 0x1ba   : > { %v798_v51 = vadd.f32 %v785_v57, %v693_v54  ;;  %803 = vst [vmem:[#allocation2 + $0x18] sm:$0xff] %v795_v18 }
 0x1bc   : > { %806 = vst [vmem:[#allocation2 + $0x20] sm:$0xff] %v798_v51 }
 0x1bf   : > { %v780_v61 = vpop.f32.mrf.mxu1 }
 0x1c0   : > { %v796_v28 = vadd.f32 %v780_v61, %v691_v60 }
 0x1c2   : > { %804 = vst [vmem:[#allocation2 + $0x10] sm:$0xff] %v796_v28 }
 0x1c5   : > { %v788_v62 = vpop.f32.mrf.mxu3 }
 0x1c6   : > { %v799_v59 = vadd.f32 %v788_v62, %v694_v19 }
 0x1c8   : > { %807 = vst [vmem:[#allocation2 + $0x28] sm:$0xff] %v799_v59 }
 0x1cc   : > { %812 = sbr.rel (%p1097_p8) target bundleno = 474 (0x1da), region = 64 }
 0x1cd   : > { %v790_v0 = vpop.f32.mrf.mxu3 }
 0x1ce   : > { %v800_v1 = vadd.f32 %v790_v0, %v695_v63 }
 0x1d0   : > { %808 = vst [vmem:[#allocation2 + $0x38] sm:$0xff] %v800_v1 }
 0x1d1   : > { %v813_v2 = vld [vmem:[#allocation2 + $0x30] sm:$0xff]  ;;  %v814_v4 = vld [vmem:[#allocation2] sm:$0xff]  ;;  %v815_v24 = vld [vmem:[#allocation2 + $0x18] sm:$0xff] }
 0x1d2   : > { %821 = vst [vmem:[%s1811_s1] sm:$0xff] %v813_v2  ;;  %v816_v5 = vld [vmem:[#allocation2 + $0x10] sm:$0xff]  ;;  %v817_v36 = vld [vmem:[#allocation2 + $0x8] sm:$0xff]  ;;  %v818_v6 = vld [vmem:[#allocation2 + $0x20] sm:$0xff] }
 0x1d3   : > { %822 = vst [vmem:[%s1811_s1 + $0x8] sm:$0xff] %v814_v4  ;;  %v819_v7 = vld [vmem:[#allocation2 + $0x28] sm:$0xff] }
 0x1d4   : > { %823 = vst [vmem:[%s1811_s1 + $0x10] sm:$0xff] %v815_v24 }
 0x1d5   : > { %824 = vst [vmem:[%s1811_s1 + $0x18] sm:$0xff] %v816_v5 }
 0x1d6   : > { %825 = vst [vmem:[%s1811_s1 + $0x20] sm:$0xff] %v817_v36 }
 0x1d7   : > { %v820_v8 = vld [vmem:[#allocation2 + $0x38] sm:$0xff]  ;;  %826 = vst [vmem:[%s1811_s1 + $0x28] sm:$0xff] %v818_v6 }
 0x1d8   : > { %827 = vst [vmem:[%s1811_s1 + $0x30] sm:$0xff] %v819_v7 }
 0x1d9   : > { %828 = vst [vmem:[%s1811_s1 + $0x38] sm:$0xff] %v820_v8 }
 0x1da PF: > { %s2072_s5 = sld [smem:[#allocation19_spill]]  ;;  %s842_s18 = sshll.u32 %s1811_s1, 4  ;;  %s843_s18 = int_to_ptr.vmem [resolvable:$true] %s842_s18 }
 0x1db   : > { %s2073_s11 = sld [smem:[#allocation30_spill]]  ;;  %s830_s13 = scalar_lea.sflag [#allocation5], %s1781_s21 }
 0x1e0   : > { %s1125_s24 = sshll.u32 %s2072_s5, 6 }
 0x1e1   : > { %s841_s20 = scalar_lea.hbm %s2073_s11, %s1125_s24  ;;  %s1438_s6 = scalar_lea.hbm %s2073_s11, 128 }
 0x1e2   : > { %s844_s27 = sshll.u32 %s841_s20, 4  ;;  %s845_s27 = int_to_ptr.hbm [resolvable:$true] %s844_s27 }
 0x1e3   : > { %s1432_s0 = sshra.s32 %s845_s27, 4  ;;  %s1433_s0 = int_to_ptr.hbm [resolvable:$true] %s1432_s0 }
 0x1e4   : > { %s1434_s2 = scalar_lea.hbm %s1433_s0, 64  ;;  %p1439_p4 = scmp.lt.s32.totalorder %s1433_s0, %s2073_s11 }
 0x1e5   : > { %p1435_p11 = scmp.ne.s32.totalorder %s1433_s0, %s1434_s2  ;;  %p1440_p6 = scmp.lt.s32.totalorder %s1438_s6, %s1434_s2 }
 0x1e7   : > { %p1436_p12 = pnand %p1435_p11, %p1736_p1  ;;  %p1441_p0 = por %p1440_p6, %p1439_p4 }
 0x1e9   : > { %p1437_p13 = pneg %p1436_p12 }
 0x1eb   : > { %p1442_p7 = pnand %p1441_p0, %p1437_p13 }
 0x1ed   : > { %1445 = shalt.err (!%p1442_p7)
}
 0x1ee   : > { %s1553_s21 = smov 128   ;;  %s1554_s10 = smov 8  }
 0x1ef   : > { %1150 = dma.vmem_to_hbm [thread:$0]  (%p1736_p1), %s843_s18, 1024, %s845_s27, %s830_s13, %s1553_s21, %s1553_s21, %s1554_s10  }
 0x1f0 PF: > { %s2074_s17 = sld [smem:[#allocation21_spill]] }
 0x1f1   : > { %s2075_s14 = sld [smem:[#allocation17_spill]] }
 0x1f6   : > { %p1170_p9 = scmp.ge.s32.totalorder %s2074_s17, 2 }
 0x1f7   : > { %s859_s30 = sand.u32 1, %s2075_s14  }
 0x1f8   : > { %p1166_p3 = pnand %p1170_p9, %p1743_p2  ;;  %s860_s1 = scalar_lea.sflag [#allocation5], %s859_s30 }
 0x1fa   : > { %p1167_p10 = pneg %p1166_p3 }
 0x1fc   : > { %1503 = dma.done.wait (%p1167_p10), %s860_s1, 1024  }
 0x1fd   : > { %1505 = vsyncadd (%p1167_p10), %s860_s1, 4294966272  ;;  %s27_s28 = sadd.s32 1, %s2074_s17   ;;  %s2077_s7 = sld [smem:[#allocation16_spill]] }
 0x1fe   : > { %p24_p5 = scmp.ge.s32.totalorder %s27_s28, 10   ;;  %s2078_s20 = sld [smem:[#allocation24_spill]] }
 0x1ff   : > { %s2079_s25 = sld [smem:[#allocation18_spill]]  ;;  %s2084_s18 = smov %s1512_s19 }
 0x200   : > { %s2080_s23 = sld [smem:[#allocation25_spill]]  ;;  %s2086_s21 = smov %s1524_s22 }
 0x201   : > { %s2081_s8 = sld [smem:[#allocation20_spill]]  ;;  %s2088_s24 = smov %s1540_s26 }
 0x202   : > { %s2082_s5 = sld [smem:[#allocation22_spill]] }
 0x203   : > { %s2083_s27 = sld [smem:[#allocation23_spill]]  ;;  %s2085_s19 = smov %s2077_s7 }
 0x204   :  { %26 = sbr.rel (!%p24_p5) target bundleno = 18 (0x12), region = 130 }
 0x205   : > { %s2087_s22 = smov %s2079_s25 }
 0x207   : > { %s2089_s25 = smov %s2081_s8 }
 0x208   : > { %s2090_s26 = smov %s2082_s5 }
 0x209   :  { %866 = vsyncpa [#allocation4], 1 }
 0x20a   :  { %868 = vsyncpa [#allocation4 + $0x1], 1 }
 0x20b   :  { %869 = vsyncpa [#allocation7], 1 }
 0x20c   :  { %871 = vsyncpa [#allocation7 + $0x1], 1 }
 0x20d   :  { %872 = vsyncpa [#allocation10], 1 }
 0x20e   :  { %874 = vsyncpa [#allocation10 + $0x1], 1 }
 0x20f   :  { %875 = vsyncpa [#allocation5], 1 }
 0x210   :  { %877 = vsyncpa [#allocation5 + $0x1], 1 }

</bundles_post_ra>
